<compile_context>
chip_gen: v7x
topology: tpu7x:2x2x1
jax: 0.10.0
libtpu: 0.0.40
codegen_flags: <defaults>
</compile_context>

<pallas_src>
import functools

import jax
import jax.numpy as jnp
from jax.experimental import pallas as pl
from jax.experimental.pallas import tpu as pltpu


def _round_up(x, m):
    return ((x + m - 1) // m) * m


def _vmem_limit_bytes():
    """Per-generation scoped-VMEM budget: ~3/4 of physical VMEM, capped at 100 MiB."""
    cap = 64 * 1024 * 1024  # v7x-safe default if the query fails
    try:
        info = pltpu.get_tpu_info()
        cap = int(getattr(info, "vmem_capacity_bytes", cap)) or cap
    except Exception:
        pass
    return min((cap * 3) // 4, 100 * 1024 * 1024)


def _choose_tiles(num_nodes):
    """Pick (n_pad, t_m, t_k): never fall back to 128-wide tiles for big graphs (pad N up
    to the tile instead), and keep >= 2 row tiles whenever possible so the 'parallel' axis
    shards across both v7x TensorCores.  t_k is a multiple of 128, t_m a multiple of 8."""
    if num_nodes <= 128:
        return 128, 128, 128
    if num_nodes <= 1024:
        n_pad = _round_up(num_nodes, 256)
        return n_pad, n_pad // 2, n_pad
    n_pad = _round_up(num_nodes, 512)
    return n_pad, 512, 512


def padded_num_nodes(num_nodes):
    """Padded node count the kernels expect A_hat to be built at."""
    return _choose_tiles(num_nodes)[0]


# ----------------------------------------------------------------------------
# Kernel 1:  HW = relu(A_hat @ (X @ W1) + b1) @ [Wmu | Wlv]
#   grid = (row_tiles, k_tiles); f32 accumulator scratch over the K axis.
#   X is either fully VMEM-resident (sliced with pl.ds) or streamed per K tile.
# ----------------------------------------------------------------------------
def _stage1_kernel(a_ref, x_ref, w1_ref, b1_ref, wcat_ref, hw_ref, acc_ref,
                   *, t_k, x_resident):
    k = pl.program_id(1)

    @pl.when(k == 0)
    def _():
        acc_ref[...] = jnp.zeros_like(acc_ref)

    if x_resident:
        start = pl.multiple_of(k * t_k, 128)
        x_blk = x_ref[pl.ds(start, t_k), :]
    else:
        x_blk = x_ref[...]

    # Fold the feature transform into the K loop (recompute is hidden under the A stream).
    xw = jnp.dot(x_blk, w1_ref[...], preferred_element_type=jnp.float32)
    acc_ref[...] += jnp.dot(a_ref[...], xw.astype(a_ref.dtype),
                            preferred_element_type=jnp.float32)

    @pl.when(k == pl.num_programs(1) - 1)
    def _():
        h = jnp.maximum(acc_ref[...] + b1_ref[...], 0.0)          # f32 bias + ReLU
        hw_ref[...] = jnp.dot(h.astype(wcat_ref.dtype), wcat_ref[...],
                              preferred_element_type=jnp.float32).astype(hw_ref.dtype)


# ----------------------------------------------------------------------------
# Kernel 2:  [mu | logvar] = A_hat @ HW + [bmu | blv]
#   Output block index is invariant in K, so accumulate directly into the resident
#   f32 output block (no scratch); bias folded into the k==0 init.
# ----------------------------------------------------------------------------
def _stage2_kernel(a_ref, hw_ref, bcat_ref, out_ref, *, t_k, hw_resident):
    k = pl.program_id(1)

    @pl.when(k == 0)
    def _():
        out_ref[...] = jnp.zeros_like(out_ref) + bcat_ref[...]    # init with the bias

    if hw_resident:
        start = pl.multiple_of(k * t_k, 128)
        hw_blk = hw_ref[pl.ds(start, t_k), :]
    else:
        hw_blk = hw_ref[...]

    out_ref[...] += jnp.dot(a_ref[...], hw_blk, preferred_element_type=jnp.float32)


# ----------------------------------------------------------------------------
# Parameter preparation (hoisted out of the per-call path; cache the result)
# ----------------------------------------------------------------------------
def prepare_gcn_params(params, dtype=jnp.bfloat16):
    in_dim, hidden = params["w1"].shape
    latent = params["wmu"].shape[1]
    in_pad = _round_up(in_dim, 128)
    h_pad = _round_up(hidden, 128)
    l2 = 2 * latent
    l2_pad = _round_up(l2, 128)

    w1 = jnp.pad(params["w1"], ((0, in_pad - in_dim), (0, h_pad - hidden))).astype(dtype)
    b1 = jnp.pad(params["b1"], ((0, 0), (0, h_pad - hidden))).astype(jnp.float32)
    wcat = jnp.concatenate([params["wmu"], params["wlv"]], axis=1)   # [hidden, 2*latent]
    bcat = jnp.concatenate([params["bmu"], params["blv"]], axis=1)   # [1, 2*latent]
    wcat = jnp.pad(wcat, ((0, h_pad - hidden), (0, l2_pad - l2))).astype(dtype)
    bcat = jnp.pad(bcat, ((0, 0), (0, l2_pad - l2))).astype(jnp.float32)

    return {"w1": w1, "b1": b1, "wcat": wcat, "bcat": bcat,
            "in_dim": in_dim, "latent": latent}


# ----------------------------------------------------------------------------
# Wrapper
# ----------------------------------------------------------------------------
def gcn_encoder_pallas(a_hat_p, x, prep, *, num_nodes=None):
    """Fused GCN-VGAE encoder forward.

    a_hat_p: [n_pad, n_pad] normalized adjacency (A_hat[target, source]) built at the
             padded size (padded_num_nodes) and in the MXU operand dtype.
    x:       [num_nodes, in_dim] node features.
    prep:    output of prepare_gcn_params().
    Returns (mu, logvar), each [num_nodes, latent] float32.
    """
    n = x.shape[0] if num_nodes is None else num_nodes
    n_pad, t_m, t_k = _choose_tiles(n)
    assert a_hat_p.shape == (n_pad, n_pad), (
        f"a_hat must be padded to {(n_pad, n_pad)} (use padded_num_nodes); "
        f"got {a_hat_p.shape}")

    op_dtype = prep["w1"].dtype
    in_pad, h_pad = prep["w1"].shape
    l2_pad = prep["wcat"].shape[1]
    latent = prep["latent"]
    in_dim = prep["in_dim"]
    esz = jnp.dtype(op_dtype).itemsize

    r_m = n_pad // t_m
    r_k = n_pad // t_k
    limit = _vmem_limit_bytes()

    # Node features, padded + cast (small: [n_pad, in_pad]).
    x_p = jnp.pad(x.astype(op_dtype), ((0, n_pad - n), (0, in_pad - in_dim)))

    # ---- stage 1: HW = relu(A @ (X @ W1) + b1) @ [Wmu|Wlv] -------------------------
    # Keep X fully VMEM-resident when it fits so A_hat is the only O(N^2) HBM stream.
    # Factors of 2 account for Pallas' default double buffering.
    fixed1 = (2 * t_m * t_k * esz                          # A tiles
              + 2 * t_m * l2_pad * esz                     # HW output tiles
              + t_m * h_pad * 4                            # f32 accumulator scratch
              + 2 * (in_pad * h_pad + h_pad * l2_pad) * esz  # W1, Wcat
              + 2 * (h_pad + l2_pad) * 4)                  # biases
    x_resident = fixed1 + 2 * n_pad * in_pad * esz <= int(0.8 * limit)
    x_spec = (pl.BlockSpec((n_pad, in_pad), lambda i, k: (0, 0)) if x_resident
              else pl.BlockSpec((t_k, in_pad), lambda i, k: (k, 0)))

    hw = pl.pallas_call(
        functools.partial(_stage1_kernel, t_k=t_k, x_resident=x_resident),
        out_shape=jax.ShapeDtypeStruct((n_pad, l2_pad), op_dtype),
        grid=(r_m, r_k),
        in_specs=[
            pl.BlockSpec((t_m, t_k), lambda i, k: (i, k)),       # A_hat tile (streamed)
            x_spec,                                              # X (resident or k-tiled)
            pl.BlockSpec((in_pad, h_pad), lambda i, k: (0, 0)),  # W1
            pl.BlockSpec((1, h_pad), lambda i, k: (0, 0)),       # b1 (f32)
            pl.BlockSpec((h_pad, l2_pad), lambda i, k: (0, 0)),  # Wmu|Wlv
        ],
        out_specs=pl.BlockSpec((t_m, l2_pad), lambda i, k: (i, 0)),
        scratch_shapes=[pltpu.VMEM((t_m, h_pad), jnp.float32)],
        compiler_params=pltpu.CompilerParams(
            dimension_semantics=("parallel", "arbitrary"),
            vmem_limit_bytes=limit,
        ),
    )(a_hat_p, x_p, prep["w1"], prep["b1"], prep["wcat"])

    # ---- stage 2: [mu | logvar] = A @ HW + [bmu|blv] -------------------------------
    fixed2 = (2 * t_m * t_k * esz        # A tiles
              + 2 * t_m * l2_pad * 4     # f32 output tiles (double as accumulator)
              + 2 * l2_pad * 4)          # bias
    hw_resident = fixed2 + 2 * n_pad * l2_pad * esz <= int(0.8 * limit)
    hw_spec = (pl.BlockSpec((n_pad, l2_pad), lambda i, k: (0, 0)) if hw_resident
               else pl.BlockSpec((t_k, l2_pad), lambda i, k: (k, 0)))

    out = pl.pallas_call(
        functools.partial(_stage2_kernel, t_k=t_k, hw_resident=hw_resident),
        out_shape=jax.ShapeDtypeStruct((n_pad, l2_pad), jnp.float32),
        grid=(r_m, r_k),
        in_specs=[
            pl.BlockSpec((t_m, t_k), lambda i, k: (i, k)),
            hw_spec,
            pl.BlockSpec((1, l2_pad), lambda i, k: (0, 0)),
        ],
        out_specs=pl.BlockSpec((t_m, l2_pad), lambda i, k: (i, 0)),
        compiler_params=pltpu.CompilerParams(
            dimension_semantics=("parallel", "arbitrary"),
            vmem_limit_bytes=limit,
        ),
    )(a_hat_p, hw, prep["bcat"])

    mu = out[:n, :latent]
    logvar = out[:n, latent:2 * latent]
    return mu, logvar


# ----------------------------------------------------------------------------
# Plain-JAX glue: GCN normalization (scatter -> dense normalized adjacency),
# built directly at padded shape in the MXU storage dtype.
# ----------------------------------------------------------------------------
def build_normalized_adjacency(edge_index, edge_weight, num_nodes, n_pad=None,
                               dtype=jnp.float32):
    if n_pad is None:
        n_pad = num_nodes
    row = edge_index[0]   # source
    col = edge_index[1]   # target
    loop = jnp.arange(num_nodes, dtype=edge_index.dtype)
    row = jnp.concatenate([row, loop])
    col = jnp.concatenate([col, loop])
    w = jnp.concatenate([edge_weight.astype(jnp.float32),
                         jnp.ones((num_nodes,), jnp.float32)])

    deg = jnp.zeros((num_nodes,), jnp.float32).at[col].add(w)
    deg_inv_sqrt = jnp.where(deg > 0, jax.lax.rsqrt(deg), 0.0)
    norm = deg_inv_sqrt[row] * w * deg_inv_sqrt[col]

    # A_hat[target, source] so that A_hat @ X aggregates messages at target nodes.
    return jnp.zeros((n_pad, n_pad), dtype=dtype).at[col, row].add(norm.astype(dtype))


def init_params(key, in_dim, hidden, latent):
    k1, k2, k3 = jax.random.split(key, 3)

    def glorot(k, fan_in, fan_out):
        scale = jnp.sqrt(6.0 / (fan_in + fan_out))
        return jax.random.uniform(k, (fan_in, fan_out), jnp.float32, -scale, scale)

    return {
        "w1": glorot(k1, in_dim, hidden),
        "b1": jnp.zeros((1, hidden), jnp.float32),
        "wmu": glorot(k2, hidden, latent),
        "bmu": jnp.zeros((1, latent), jnp.float32),
        "wlv": glorot(k3, hidden, latent),
        "blv": jnp.zeros((1, latent), jnp.float32),
    }


def gcn_encoder_reference(a_hat, x, params):
    h = jax.nn.relu(a_hat @ (x @ params["w1"]) + params["b1"])
    mu = a_hat @ (h @ params["wmu"]) + params["bmu"]
    logvar = a_hat @ (h @ params["wlv"]) + params["blv"]
    return mu, logvar


if __name__ == "__main__":
    key = jax.random.PRNGKey(0)
    k_x, k_ei, k_ew, k_p = jax.random.split(key, 4)

    num_nodes = 16
    in_dim = 8
    hidden = 32
    latent = 16
    num_edges = 40

    x = jax.random.normal(k_x, (num_nodes, in_dim), jnp.float32)
    edge_index = jax.random.randint(k_ei, (2, num_edges), 0, num_nodes, jnp.int32)
    edge_weight = jax.random.uniform(k_ew, (num_edges,), jnp.float32, 0.1, 1.0)

    params = init_params(k_p, in_dim, hidden, latent)
    prep = prepare_gcn_params(params, dtype=jnp.bfloat16)        # cache across calls

    n_pad = padded_num_nodes(num_nodes)
    a_hat_p = build_normalized_adjacency(edge_index, edge_weight, num_nodes,
                                         n_pad=n_pad, dtype=jnp.bfloat16)

    mu, logvar = gcn_encoder_pallas(a_hat_p, x, prep, num_nodes=num_nodes)
    jax.block_until_ready((mu, logvar))

    assert mu.shape == (num_nodes, latent) and logvar.shape == (num_nodes, latent)

    # bf16 MXU operands with f32 accumulation: compare against the f32 reference.
    a_hat_f32 = build_normalized_adjacency(edge_index, edge_weight, num_nodes)
    mu_ref, lv_ref = gcn_encoder_reference(a_hat_f32, x, params)
    assert jnp.allclose(mu, mu_ref, atol=5e-2, rtol=5e-2)
    assert jnp.allclose(logvar, lv_ref, atol=5e-2, rtol=5e-2)

    print("KERNEL_OK")
</pallas_src>

<mosaic_0001>
module attributes {stable_mosaic.version = 11 : i64} {
  func.func @_stage1_kernel(%arg0: i32, %arg1: i32, %arg2: memref<128x128xbf16, #tpu.memory_space<vmem>>, %arg3: memref<128x128xbf16, #tpu.memory_space<vmem>>, %arg4: memref<128x128xbf16, #tpu.memory_space<vmem>>, %arg5: memref<1x128xf32, #tpu.memory_space<vmem>>, %arg6: memref<128x128xbf16, #tpu.memory_space<vmem>>, %arg7: memref<128x128xbf16, #tpu.memory_space<vmem>>, %arg8: memref<128x128xf32, #tpu.memory_space<vmem>>) attributes {dimension_semantics = [#tpu.dimension_semantics<parallel>, #tpu.dimension_semantics<arbitrary>], iteration_bounds = array<i64: 1, 1>, scalar_prefetch = 0 : i64, scratch_operands = 1 : i64, tpu.core_type = #tpu.core_type<tc>, window_params = [{transform_indices = @transform_0, window_bounds = array<i64: 128, 128>}, {pipeline_mode = #tpu.pipeline_mode<synchronous>, transform_indices = @transform_1, window_bounds = array<i64: 128, 128>}, {pipeline_mode = #tpu.pipeline_mode<synchronous>, transform_indices = @transform_2, window_bounds = array<i64: 128, 128>}, {pipeline_mode = #tpu.pipeline_mode<synchronous>, transform_indices = @transform_3, window_bounds = array<i64: 1, 128>}, {pipeline_mode = #tpu.pipeline_mode<synchronous>, transform_indices = @transform_4, window_bounds = array<i64: 128, 128>}, {transform_indices = @transform_5, window_bounds = array<i64: 128, 128>}]} {
    %c0_i32 = arith.constant 0 : i32
    %0 = arith.cmpi eq, %arg1, %c0_i32 : i32
    %1 = arith.extui %0 : i1 to i32
    %c0_i32_0 = arith.constant 0 : i32
    %2 = arith.cmpi ne, %1, %c0_i32_0 : i32
    scf.if %2 {
      %cst_12 = arith.constant 0.000000e+00 : f32
      %18 = vector.broadcast %cst_12 : f32 to vector<128x128xf32>
      %c0_13 = arith.constant 0 : index
      %c0_14 = arith.constant 0 : index
      %19 = vector.load %arg8[%c0_13, %c0_14] : memref<128x128xf32, #tpu.memory_space<vmem>>, vector<128x128xf32>
      tpu.vector_store %arg8[%c0_13, %c0_14], %18 {strides = array<i32>} : memref<128x128xf32, #tpu.memory_space<vmem>>, vector<128x128xf32>,
    } else {
    }
    %c128_i32 = arith.constant 128 : i32
    %3 = arith.muli %arg1, %c128_i32 : i32
    %4 = tpu.assume_multiple %3, 128 : i32
    %5 = arith.index_cast %4 : i32 to index
    %c0 = arith.constant 0 : index
    %6 = vector.load %arg3[%5, %c0] : memref<128x128xbf16, #tpu.memory_space<vmem>>, vector<128x128xbf16>
    %c0_1 = arith.constant 0 : index
    %c0_2 = arith.constant 0 : index
    %7 = vector.load %arg4[%c0_1, %c0_2] : memref<128x128xbf16, #tpu.memory_space<vmem>>, vector<128x128xbf16>
    %cst = arith.constant dense<0.000000e+00> : vector<128x128xf32>
    %8 = tpu.matmul %6, %7, %cst {dimension_numbers = #tpu.dot_dimension_numbers<[1], [0], [0], [1], [0, 0, 1, 1], [], []>} : vector<128x128xbf16>, vector<128x128xbf16>, vector<128x128xf32> -> vector<128x128xf32>
    %c0_3 = arith.constant 0 : index
    %c0_4 = arith.constant 0 : index
    %9 = vector.load %arg8[%c0_3, %c0_4] : memref<128x128xf32, #tpu.memory_space<vmem>>, vector<128x128xf32>
    %c0_5 = arith.constant 0 : index
    %c0_6 = arith.constant 0 : index
    %10 = vector.load %arg2[%c0_5, %c0_6] : memref<128x128xbf16, #tpu.memory_space<vmem>>, vector<128x128xbf16>
    %11 = arith.truncf %8 : vector<128x128xf32> to vector<128x128xbf16>
    %cst_7 = arith.constant dense<0.000000e+00> : vector<128x128xf32>
    %12 = tpu.matmul %10, %11, %cst_7 {dimension_numbers = #tpu.dot_dimension_numbers<[1], [0], [0], [1], [0, 0, 1, 1], [], []>} : vector<128x128xbf16>, vector<128x128xbf16>, vector<128x128xf32> -> vector<128x128xf32>
    %13 = arith.addf %9, %12 : vector<128x128xf32>
    %c0_8 = arith.constant 0 : index
    %c0_9 = arith.constant 0 : index
    %14 = vector.load %arg8[%c0_8, %c0_9] : memref<128x128xf32, #tpu.memory_space<vmem>>, vector<128x128xf32>
    tpu.vector_store %arg8[%c0_8, %c0_9], %13 {strides = array<i32>} : memref<128x128xf32, #tpu.memory_space<vmem>>, vector<128x128xf32>,
    %c0_i32_10 = arith.constant 0 : i32
    %15 = arith.cmpi eq, %arg1, %c0_i32_10 : i32
    %16 = arith.extui %15 : i1 to i32
    %c0_i32_11 = arith.constant 0 : i32
    %17 = arith.cmpi ne, %16, %c0_i32_11 : i32
    scf.if %17 {
      %c0_12 = arith.constant 0 : index
      %c0_13 = arith.constant 0 : index
      %18 = vector.load %arg8[%c0_12, %c0_13] : memref<128x128xf32, #tpu.memory_space<vmem>>, vector<128x128xf32>
      %c0_14 = arith.constant 0 : index
      %c0_15 = arith.constant 0 : index
      %19 = vector.load %arg5[%c0_14, %c0_15] : memref<1x128xf32, #tpu.memory_space<vmem>>, vector<1x128xf32>
      %20 = vector.broadcast %19 : vector<1x128xf32> to vector<128x128xf32>
      %21 = arith.addf %18, %20 : vector<128x128xf32>
      %cst_16 = arith.constant 0.000000e+00 : f32
      %22 = vector.broadcast %cst_16 : f32 to vector<128x128xf32>
      %23 = arith.maximumf %21, %22 : vector<128x128xf32>
      %24 = arith.truncf %23 : vector<128x128xf32> to vector<128x128xbf16>
      %c0_17 = arith.constant 0 : index
      %c0_18 = arith.constant 0 : index
      %25 = vector.load %arg6[%c0_17, %c0_18] : memref<128x128xbf16, #tpu.memory_space<vmem>>, vector<128x128xbf16>
      %cst_19 = arith.constant dense<0.000000e+00> : vector<128x128xf32>
      %26 = tpu.matmul %24, %25, %cst_19 {dimension_numbers = #tpu.dot_dimension_numbers<[1], [0], [0], [1], [0, 0, 1, 1], [], []>} : vector<128x128xbf16>, vector<128x128xbf16>, vector<128x128xf32> -> vector<128x128xf32>
      %27 = arith.truncf %26 : vector<128x128xf32> to vector<128x128xbf16>
      %c0_20 = arith.constant 0 : index
      %c0_21 = arith.constant 0 : index
      %28 = vector.load %arg7[%c0_20, %c0_21] : memref<128x128xbf16, #tpu.memory_space<vmem>>, vector<128x128xbf16>
      tpu.vector_store %arg7[%c0_20, %c0_21], %27 {strides = array<i32>} : memref<128x128xbf16, #tpu.memory_space<vmem>>, vector<128x128xbf16>,
    } else {
    }
    return
  }
  func.func @transform_0(%arg0: i32, %arg1: i32) -> (i32, i32) {
    %c0_i32 = arith.constant 0 : i32
    return %arg0, %arg1 : i32, i32
  }
  func.func @transform_1(%arg0: i32, %arg1: i32) -> (i32, i32) {
    %c0_i32 = arith.constant 0 : i32
    %c0_i32_0 = arith.constant 0 : i32
    %c0_i32_1 = arith.constant 0 : i32
    return %c0_i32, %c0_i32_0 : i32, i32
  }
  func.func @transform_2(%arg0: i32, %arg1: i32) -> (i32, i32) {
    %c0_i32 = arith.constant 0 : i32
    %c0_i32_0 = arith.constant 0 : i32
    %c0_i32_1 = arith.constant 0 : i32
    return %c0_i32, %c0_i32_0 : i32, i32
  }
  func.func @transform_3(%arg0: i32, %arg1: i32) -> (i32, i32) {
    %c0_i32 = arith.constant 0 : i32
    %c0_i32_0 = arith.constant 0 : i32
    %c0_i32_1 = arith.constant 0 : i32
    return %c0_i32, %c0_i32_0 : i32, i32
  }
  func.func @transform_4(%arg0: i32, %arg1: i32) -> (i32, i32) {
    %c0_i32 = arith.constant 0 : i32
    %c0_i32_0 = arith.constant 0 : i32
    %c0_i32_1 = arith.constant 0 : i32
    return %c0_i32, %c0_i32_0 : i32, i32
  }
  func.func @transform_5(%arg0: i32, %arg1: i32) -> (i32, i32) {
    %c0_i32 = arith.constant 0 : i32
    %c0_i32_0 = arith.constant 0 : i32
    return %arg0, %c0_i32 : i32, i32
  }
}

</mosaic_0001>

<bundles_post_ra>
// kernel: tpu_custom_call.1
= control target key start
LH: loop header
LB: loop body
LE: loop exit
PB: predicated region body
PF: predicated region fallthrough
CT: control target
= control target key end

     0   :  { %10 = vsyncpa [#allocation4], 0  ;;  %s1460_s0 = inlined_call_operand.hbm [shape: bf16[128,128], index: 0, kind: input, shape index: {}]   ;;  %s1461_s1 = inlined_call_operand.hbm [shape: bf16[128,128], index: 1, kind: input, shape index: {}]   ;;  %s1462_s2 = inlined_call_operand.hbm [shape: bf16[128,128], index: 2, kind: input, shape index: {}]   ;;  %s1463_s3 = inlined_call_operand.vmem [shape: f32[1,128], index: 3, kind: input, shape index: {}]   ;;  %s1464_s4 = inlined_call_operand.hbm [shape: bf16[128,128], index: 4, kind: input, shape index: {}]   ;;  %s1465_s5 = inlined_call_operand.hbm [shape: bf16[128,128], index: 5, kind: output, shape index: {}]  }
   0x1   :  { %11 = vsyncpa [#allocation7], 0 }
   0x2   :  { %12 = vsyncpa [#allocation10], 0 }
   0x3   :  { %13 = vsyncpa [#allocation5], 0  ;;  %s1301_s18 = smov [#allocation6]   ;;  %s1302_s20 = smov [#allocation3]  }
   0x4   :  { %s31_s19 = sshll.u32 %s1301_s18, 4  ;;  %s19_s21 = sshll.u32 %s1302_s20, 4  ;;  %s32_s19 = int_to_ptr.vmem [resolvable:$true] %s31_s19  ;;  %s1338_s21 = int_to_ptr.vmem [resolvable:$true] %s19_s21 }
   0x5   :  { %s1183_s24 = scalar_lea.hbm %s1461_s1, 1024 }
   0x6   :  { %p1184_p0 = scmp.ne.s32.totalorder %s1461_s1, %s1183_s24  ;;  %p1187_p1 = scmp.lt.u32.totalorder %s1183_s24, %s1461_s1 }
   0x8   :  { %p1189_p2 = pnand %p1187_p1, %p1184_p0 }
   0xa   :  { %1192 = shalt.err (!%p1189_p2)
}
   0xb   :  { %s1193_s29 = scalar_lea.vmem %s32_s19, 1024  ;;  %p1198_p4 = scmp.lt.s32.totalorder %s32_s19, %s32_s19 }
   0xc   :  { %p1194_p3 = scmp.ne.s32.totalorder %s32_s19, %s1193_s29  ;;  %p1199_p5 = scmp.lt.s32.totalorder %s1193_s29, %s1193_s29 }
   0xe   :  { %p1200_p6 = por %p1199_p5, %p1198_p4 }
  0x10   :  { %p1201_p7 = pnand %p1200_p6, %p1194_p3 }
  0x12   :  { %1204 = shalt.err (!%p1201_p7)
}
  0x13   :  { %s1303_s30 = smov 64   ;;  %s1304_s6 = smov 4  }
  0x14   :  { %37 = dma.hbm_to_vmem [thread:$0]  %s1461_s1, 1024, %s32_s19, [#allocation7], %s1303_s30, %s1303_s30, %s1304_s6  }
  0x15   :  { %s1205_s11 = scalar_lea.hbm %s1460_s0, 1024 }
  0x16   :  { %p1206_p8 = scmp.ne.s32.totalorder %s1460_s0, %s1205_s11  ;;  %p1209_p9 = scmp.lt.u32.totalorder %s1205_s11, %s1460_s0 }
  0x18   :  { %p1211_p10 = pnand %p1209_p9, %p1206_p8 }
  0x1a   :  { %1214 = shalt.err (!%p1211_p10)
}
  0x1b   :  { %s1215_s16 = scalar_lea.vmem %s1338_s21, 1024  ;;  %p1220_p12 = scmp.lt.s32.totalorder %s1338_s21, %s1338_s21 }
  0x1c   :  { %p1216_p11 = scmp.ne.s32.totalorder %s1338_s21, %s1215_s16  ;;  %p1221_p13 = scmp.lt.s32.totalorder %s1215_s16, %s1215_s16 }
  0x1e   :  { %p1222_p0 = por %p1221_p13, %p1220_p12 }
  0x20   :  { %p1223_p1 = pnand %p1222_p0, %p1216_p11 }
  0x22   :  { %1226 = shalt.err (!%p1223_p1)
}
  0x23   :  { %25 = dma.hbm_to_vmem [thread:$0]  %s1460_s0, 1024, %s1338_s21, [#allocation4], %s1303_s30, %s1303_s30, %s1304_s6  }
  0x24   :  { %s1305_s18 = smov [#allocation8]   ;;  %s1306_s20 = smov [#allocation9]  }
  0x25   :  { %s43_s19 = sshll.u32 %s1305_s18, 4  ;;  %s57_s22 = sshll.u32 %s1306_s20, 4  ;;  %s44_s19 = int_to_ptr.vmem [resolvable:$true] %s43_s19  ;;  %s1375_s22 = int_to_ptr.vmem [resolvable:$true] %s57_s22 }
  0x26   :  { %s1227_s25 = scalar_lea.hbm %s1462_s2, 1024 }
  0x27   :  { %p1228_p2 = scmp.ne.s32.totalorder %s1462_s2, %s1227_s25  ;;  %p1231_p3 = scmp.lt.u32.totalorder %s1227_s25, %s1462_s2 }
  0x29   :  { %p1233_p4 = pnand %p1231_p3, %p1228_p2 }
  0x2b   :  { %1236 = shalt.err (!%p1233_p4)
}
  0x2c   :  { %s1237_s0 = scalar_lea.vmem %s44_s19, 1024  ;;  %p1242_p6 = scmp.lt.s32.totalorder %s44_s19, %s44_s19 }
  0x2d   :  { %p1238_p5 = scmp.ne.s32.totalorder %s44_s19, %s1237_s0  ;;  %p1243_p7 = scmp.lt.s32.totalorder %s1237_s0, %s1237_s0 }
  0x2f   :  { %p1244_p8 = por %p1243_p7, %p1242_p6 }
  0x31   :  { %p1245_p9 = pnand %p1244_p8, %p1238_p5 }
  0x33   :  { %1248 = shalt.err (!%p1245_p9)
}
  0x34   :  { %49 = dma.hbm_to_vmem [thread:$0]  %s1462_s2, 1024, %s44_s19, [#allocation7], %s1303_s30, %s1303_s30, %s1304_s6  }
  0x35   :  { %s1249_s10 = scalar_lea.hbm %s1464_s4, 1024 }
  0x36   :  { %p1250_p10 = scmp.ne.s32.totalorder %s1464_s4, %s1249_s10  ;;  %p1253_p11 = scmp.lt.u32.totalorder %s1249_s10, %s1464_s4 }
  0x38   :  { %p1255_p12 = pnand %p1253_p11, %p1250_p10 }
  0x3a   :  { %1258 = shalt.err (!%p1255_p12)
}
  0x3b   :  { %s1259_s15 = scalar_lea.vmem %s1375_s22, 1024  ;;  %p1264_p0 = scmp.lt.s32.totalorder %s1375_s22, %s1375_s22 }
  0x3c   :  { %p1260_p13 = scmp.ne.s32.totalorder %s1375_s22, %s1259_s15  ;;  %p1265_p1 = scmp.lt.s32.totalorder %s1259_s15, %s1259_s15 }
  0x3e   :  { %p1266_p2 = por %p1265_p1, %p1264_p0 }
  0x40   :  { %p1267_p3 = pnand %p1266_p2, %p1260_p13 }
  0x42   :  { %1270 = shalt.err (!%p1267_p3)
}
  0x43   :  { %63 = dma.hbm_to_vmem [thread:$0]  %s1464_s4, 1024, %s1375_s22, [#allocation10], %s1303_s30, %s1303_s30, %s1304_s6  }
  0x44   :  { %1293 = dma.done.wait [#allocation4], 1024  }
  0x45   :  { %1294 = vsyncadd [#allocation4], 4294966272 }
  0x46   :  { %1295 = dma.done.wait [#allocation7], 2048  }
  0x47   :  { %1296 = vsyncadd [#allocation7], 4294965248 }
  0x48   :  { %1297 = dma.done.wait [#allocation10], 1024  }
  0x49   :  { %1298 = vsyncadd [#allocation10], 4294966272  ;;  %v1151_v0 = vld [vmem:[#allocation8] sm:$0xff]   ;;  %v1152_v1 = vld [vmem:[#allocation8 + $0x8] sm:$0xff]  }
  0x4a   :  { %1032 = vmatprep.subr.bf16.mxu0 %v1151_v0  ;;  %v1153_v2 = vld [vmem:[#allocation8 + $0x10] sm:$0xff]   ;;  %v1154_v3 = vld [vmem:[#allocation8 + $0x18] sm:$0xff]   ;;  %v1159_v4 = vld [vmem:[#allocation6] sm:$0xff]  }
  0x4b   :  { %1033 = vmatpush3.bf16.msra.mxu0 %v1151_v0  ;;  %1048 = vmatprep.mubr.bf16.mxu0 %v1159_v4  ;;  %v1155_v5 = vld [vmem:[#allocation8 + $0x20] sm:$0xff]   ;;  %v1156_v6 = vld [vmem:[#allocation8 + $0x28] sm:$0xff]   ;;  %v1157_v7 = vld [vmem:[#allocation8 + $0x30] sm:$0xff]  }
  0x4c   :  { %1034 = vmatprep.subr.bf16.mxu0 %v1152_v1  ;;  %v1158_v8 = vld [vmem:[#allocation8 + $0x38] sm:$0xff]   ;;  %v1160_v9 = vld [vmem:[#allocation6 + $0x8] sm:$0xff]   ;;  %v1161_v10 = vld [vmem:[#allocation6 + $0x10] sm:$0xff]  }
  0x4d   :  { %v1162_v11 = vld [vmem:[#allocation6 + $0x18] sm:$0xff]   ;;  %v1163_v12 = vld [vmem:[#allocation6 + $0x20] sm:$0xff]   ;;  %v1164_v13 = vld [vmem:[#allocation6 + $0x28] sm:$0xff]  }
  0x4e   :  { %v1165_v14 = vld [vmem:[#allocation6 + $0x30] sm:$0xff]   ;;  %v1166_v15 = vld [vmem:[#allocation6 + $0x38] sm:$0xff]   ;;  %v1167_v16 = vld [vmem:[#allocation3] sm:$0xff]  }
  0x4f   :  { %1035 = vmatpush3.bf16.msra.mxu0 %v1152_v1  ;;  %1080 = vmatprep.mubr.bf16.mxu1 %v1167_v16  ;;  %v1175_v17 = vld [vmem:[#allocation9] sm:$0xff]   ;;  %v1412_v18 = vld [vmem:[#allocation9 + $0x8] sm:$0xff]   ;;  %v1415_v19 = vld [vmem:[#allocation9 + $0x10] sm:$0xff]  }
  0x50   :  { %1036 = vmatprep.subr.bf16.mxu0 %v1153_v2  ;;  %v1419_v20 = vld [vmem:[#allocation9 + $0x18] sm:$0xff]   ;;  %v1423_v21 = vld [vmem:[#allocation9 + $0x20] sm:$0xff]   ;;  %v1427_v22 = vld [vmem:[#allocation9 + $0x28] sm:$0xff]  }
  0x51   :  { %v1168_v47 = vld [vmem:[#allocation3 + $0x8] sm:$0xff]   ;;  %v1169_v48 = vld [vmem:[#allocation3 + $0x10] sm:$0xff]   ;;  %v1170_v49 = vld [vmem:[#allocation3 + $0x18] sm:$0xff]  }
  0x52   :  { %v1171_v50 = vld [vmem:[#allocation3 + $0x20] sm:$0xff]   ;;  %v1172_v51 = vld [vmem:[#allocation3 + $0x28] sm:$0xff]   ;;  %v1173_v52 = vld [vmem:[#allocation3 + $0x30] sm:$0xff]  }
  0x53   :  { %1037 = vmatpush3.bf16.msra.mxu0 %v1153_v2  ;;  %v1174_v53 = vld [vmem:[#allocation3 + $0x38] sm:$0xff]   ;;  %v1181_v54 = vld [vmem:[#allocation9 + $0x30] sm:$0xff]   ;;  %v896_v56 = vld [vmem:[%s1463_s3] ss:$0 sm:$0xff]  ;;  %s1307_s3 = smov [#allocation11]  }
  0x54   :  { %1038 = vmatprep.subr.bf16.mxu0 %v1154_v3  ;;  %v1182_v55 = vld [vmem:[#allocation9 + $0x38] sm:$0xff]   ;;  %s856_s17 = sshll.u32 %s1307_s3, 4  ;;  %s857_s17 = int_to_ptr.vmem [resolvable:$true] %s856_s17 }
  0x55   :  { %s1271_s18 = scalar_lea.vmem %s857_s17, 1024  ;;  %p1276_p5 = scmp.lt.s32.totalorder %s857_s17, %s857_s17 }
  0x56   :  { %p1272_p4 = scmp.ne.s32.totalorder %s857_s17, %s1271_s18  ;;  %p1277_p6 = scmp.lt.s32.totalorder %s1271_s18, %s1271_s18 }
  0x57   :  { %1039 = vmatpush3.bf16.msra.mxu0 %v1154_v3 }
  0x58   :  { %1040 = vmatprep.subr.bf16.mxu0 %v1155_v5  ;;  %p1278_p7 = por %p1277_p6, %p1276_p5 }
  0x5a   :  { %p1279_p8 = pnand %p1278_p7, %p1272_p4 }
  0x5b   :  { %1041 = vmatpush3.bf16.msra.mxu0 %v1155_v5 }
  0x5c   :  { %1042 = vmatprep.subr.bf16.mxu0 %v1156_v6 }
  0x5f   :  { %1043 = vmatpush3.bf16.msra.mxu0 %v1156_v6 }
  0x60   :  { %1044 = vmatprep.subr.bf16.mxu0 %v1157_v7 }
  0x63   :  { %1045 = vmatpush3.bf16.msra.mxu0 %v1157_v7 }
  0x64   :  { %1046 = vmatprep.subr.bf16.mxu0 %v1158_v8 }
  0x67   :  { %1047 = vmatpush3.bf16.msra.mxu0 %v1158_v8 }
  0x68   :  { %1096 = vmatprep.subr.bf16.mxu0 %v1175_v17 }
  0x6a   :  { %1049 = vmatmul.mubr.bf16.vlgmr.msra.gmra.mrb[0].mxu0 %v1160_v9 }
  0x6b   :  { %1052 = vmatprep.mubr.bf16.mxu0 %v1161_v10  ;;  %1097 = vmatpush3.bf16.msra.mxu0 %v1175_v17 }
  0x6c   :  { %1098 = vmatprep.subr.bf16.mxu0 %v1412_v18 }
  0x6f   :  { %1099 = vmatpush3.bf16.msra.mxu0 %v1412_v18 }
  0x70   :  { %1100 = vmatprep.subr.bf16.mxu0 %v1415_v19 }
  0x72   :  { %1053 = vmatmul.mubr.bf16.gmra.mrb[4].mxu0 %v1162_v11 }
  0x73   :  { %1056 = vmatprep.mubr.bf16.mxu0 %v1163_v12  ;;  %1101 = vmatpush3.bf16.msra.mxu0 %v1415_v19 }
  0x74   :  { %1102 = vmatprep.subr.bf16.mxu0 %v1419_v20 }
  0x77   :  { %1103 = vmatpush3.bf16.msra.mxu0 %v1419_v20 }
  0x78   :  { %1104 = vmatprep.subr.bf16.mxu0 %v1423_v21 }
  0x7a   :  { %1057 = vmatmul.mubr.bf16.gmra.mrb[8].mxu0 %v1164_v13 }
  0x7b   :  { %1060 = vmatprep.mubr.bf16.mxu0 %v1165_v14  ;;  %1105 = vmatpush3.bf16.msra.mxu0 %v1423_v21 }
  0x7c   :  { %1106 = vmatprep.subr.bf16.mxu0 %v1427_v22 }
  0x7f   :  { %1107 = vmatpush3.bf16.msra.mxu0 %v1427_v22 }
  0x80   :  { %1108 = vmatprep.subr.bf16.mxu0 %v1181_v54 }
  0x82   :  { %1061 = vmatmul.mubr.bf16.gmra.mrb[12].mxu0 %v1166_v15 }
  0x83   :  { %1109 = vmatpush3.bf16.msra.mxu0 %v1181_v54 }
  0x84   :  { %1110 = vmatprep.subr.bf16.mxu0 %v1182_v55 }
  0x87   :  { %1111 = vmatpush3.bf16.msra.mxu0 %v1182_v55 }
 0x13d   :  { %v1050_v23 = vpop.f32.mrb[0].mxu0 }
 0x13e   :  { %v264_v24 = vpop.f32.mrb[1].mxu0 }
 0x13f   :  { %v1051_v25 = vpop.f32.mrb[2].mxu0 }
 0x140   :  { %v360_v26 = vpack.c.bf16 %v1051_v25, %v1050_v23  ;;  %v267_v27 = vpop.f32.mrb[3].mxu0 }
 0x141   :  { %v359_v28 = vpack.c.bf16 %v267_v27, %v264_v24 }
 0x143   :  { %1064 = vmatprep.subr.bf16.mxu1 %v359_v28 }
 0x144   :  { %1065 = vmatpush3.bf16.msra.mxu1 %v359_v28 }
 0x145   :  { %v1054_v29 = vpop.f32.mrb[4].mxu0  ;;  %1066 = vmatprep.subr.bf16.mxu1 %v360_v26 }
 0x146   :  { %v280_v30 = vpop.f32.mrb[5].mxu0 }
 0x147   :  { %v1055_v31 = vpop.f32.mrb[6].mxu0 }
 0x148   :  { %v362_v32 = vpack.c.bf16 %v1055_v31, %v1054_v29  ;;  %v283_v33 = vpop.f32.mrb[7].mxu0  ;;  %1067 = vmatpush3.bf16.msra.mxu1 %v360_v26 }
 0x149   :  { %v361_v34 = vpack.c.bf16 %v283_v33, %v280_v30 }
 0x14b   :  { %1068 = vmatprep.subr.bf16.mxu1 %v361_v34 }
 0x14c   :  { %1069 = vmatpush3.bf16.msra.mxu1 %v361_v34 }
 0x14d   :  { %v1058_v35 = vpop.f32.mrb[8].mxu0  ;;  %1070 = vmatprep.subr.bf16.mxu1 %v362_v32 }
 0x14e   :  { %v296_v36 = vpop.f32.mrb[9].mxu0 }
 0x14f   :  { %v1059_v37 = vpop.f32.mrb[10].mxu0 }
 0x150   :  { %v364_v38 = vpack.c.bf16 %v1059_v37, %v1058_v35  ;;  %v299_v39 = vpop.f32.mrb[11].mxu0  ;;  %1071 = vmatpush3.bf16.msra.mxu1 %v362_v32 }
 0x151   :  { %v363_v40 = vpack.c.bf16 %v299_v39, %v296_v36 }
 0x153   :  { %1072 = vmatprep.subr.bf16.mxu1 %v363_v40 }
 0x154   :  { %1073 = vmatpush3.bf16.msra.mxu1 %v363_v40 }
 0x155   :  { %v1062_v41 = vpop.f32.mrb[12].mxu0  ;;  %1074 = vmatprep.subr.bf16.mxu1 %v364_v38 }
 0x156   :  { %v312_v42 = vpop.f32.mrb[13].mxu0 }
 0x157   :  { %v1063_v43 = vpop.f32.mrb[14].mxu0 }
 0x158   :  { %v366_v44 = vpack.c.bf16 %v1063_v43, %v1062_v41  ;;  %v315_v45 = vpop.f32.mrb[15].mxu0  ;;  %1075 = vmatpush3.bf16.msra.mxu1 %v364_v38 }
 0x159   :  { %v365_v46 = vpack.c.bf16 %v315_v45, %v312_v42 }
 0x15b   :  { %1076 = vmatprep.subr.bf16.mxu1 %v365_v46 }
 0x15c   :  { %1077 = vmatpush3.bf16.msra.mxu1 %v365_v46 }
 0x15d   :  { %1078 = vmatprep.subr.bf16.mxu1 %v366_v44 }
 0x160   :  { %1079 = vmatpush3.bf16.msra.mxu1 %v366_v44 }
 0x161   :  { %1128 = vmatprep.subr.bf16.mxu1 %v1175_v17 }
 0x163   :  { %1081 = vmatmul.mubr.bf16.vlgmr.msra.gmra.mrb[0].mxu1 %v1168_v47 }
 0x164   :  { %1084 = vmatprep.mubr.bf16.mxu1 %v1169_v48  ;;  %1136 = vmatpush3.bf16.msra.mxu1 %v1175_v17 }
 0x165   :  { %1129 = vmatprep.subr.bf16.mxu1 %v1412_v18 }
 0x168   :  { %1137 = vmatpush3.bf16.msra.mxu1 %v1412_v18 }
 0x169   :  { %1130 = vmatprep.subr.bf16.mxu1 %v1415_v19 }
 0x16b   :  { %1085 = vmatmul.mubr.bf16.gmra.mrb[4].mxu1 %v1170_v49 }
 0x16c   :  { %1088 = vmatprep.mubr.bf16.mxu1 %v1171_v50  ;;  %1138 = vmatpush3.bf16.msra.mxu1 %v1415_v19 }
 0x16d   :  { %1131 = vmatprep.subr.bf16.mxu1 %v1419_v20 }
 0x170   :  { %1139 = vmatpush3.bf16.msra.mxu1 %v1419_v20 }
 0x171   :  { %1132 = vmatprep.subr.bf16.mxu1 %v1423_v21 }
 0x173   :  { %1089 = vmatmul.mubr.bf16.gmra.mrb[8].mxu1 %v1172_v51 }
 0x174   :  { %1092 = vmatprep.mubr.bf16.mxu1 %v1173_v52  ;;  %1140 = vmatpush3.bf16.msra.mxu1 %v1423_v21 }
 0x175   :  { %1133 = vmatprep.subr.bf16.mxu1 %v1427_v22 }
 0x178   :  { %1141 = vmatpush3.bf16.msra.mxu1 %v1427_v22 }
 0x179   :  { %1134 = vmatprep.subr.bf16.mxu1 %v1181_v54 }
 0x17b   :  { %1093 = vmatmul.mubr.bf16.gmra.mrb[12].mxu1 %v1174_v53 }
 0x17c   :  { %1142 = vmatpush3.bf16.msra.mxu1 %v1181_v54 }
 0x17d   :  { %1135 = vmatprep.subr.bf16.mxu1 %v1182_v55 }
 0x180   :  { %1143 = vmatpush3.bf16.msra.mxu1 %v1182_v55 }
 0x236   :  { %v1082_v57 = vpop.f32.mrb[0].mxu1 }
 0x237   :  { %v572_v58 = vadd.f32 %v1082_v57, %v896_v56  ;;  %v449_v59 = vpop.f32.mrb[1].mxu1 }
 0x238   :  { %v570_v60 = vadd.f32 %v896_v56, %v449_v59  ;;  %v1083_v61 = vpop.f32.mrb[2].mxu1 }
 0x239   :  { %v573_v62 = vadd.f32 %v1083_v61, %v896_v56  ;;  %v452_v63 = vpop.f32.mrb[3].mxu1  ;;  %v588_v1 = vmax.f32 %v572_v58, 0.0 }
 0x23a   :  { %v571_v0 = vadd.f32 %v896_v56, %v452_v63  ;;  %v586_v3 = vmax.f32 %v570_v60, 0.0 }
 0x23b   :  { %v589_v2 = vmax.f32 %v573_v62, 0.0 }
 0x23c   :  { %v587_v4 = vmax.f32 %v571_v0, 0.0 }
 0x23d   :  { %v603_v5 = vpack.c.bf16 %v589_v2, %v588_v1 }
 0x23e   :  { %v602_v6 = vpack.c.bf16 %v587_v4, %v586_v3  ;;  %v1086_v7 = vpop.f32.mrb[4].mxu1 }
 0x23f   :  { %v576_v8 = vadd.f32 %v1086_v7, %v896_v56  ;;  %v465_v9 = vpop.f32.mrb[5].mxu1 }
 0x240   :  { %v574_v10 = vadd.f32 %v896_v56, %v465_v9  ;;  %v1087_v11 = vpop.f32.mrb[6].mxu1  ;;  %1112 = vmatprep.mubr.bf16.mxu0 %v602_v6 }
 0x241   :  { %v577_v12 = vadd.f32 %v1087_v11, %v896_v56  ;;  %v468_v13 = vpop.f32.mrb[7].mxu1  ;;  %1113 = vmatmul.mubr.bf16.vlgmr.msra.gmra.mrb[16].mxu0 %v603_v5  ;;  %v592_v15 = vmax.f32 %v576_v8, 0.0 }
 0x242   :  { %v575_v14 = vadd.f32 %v896_v56, %v468_v13  ;;  %v590_v17 = vmax.f32 %v574_v10, 0.0 }
 0x243   :  { %v593_v16 = vmax.f32 %v577_v12, 0.0 }
 0x244   :  { %v591_v18 = vmax.f32 %v575_v14, 0.0 }
 0x245   :  { %v605_v19 = vpack.c.bf16 %v593_v16, %v592_v15 }
 0x246   :  { %v604_v20 = vpack.c.bf16 %v591_v18, %v590_v17  ;;  %v1090_v21 = vpop.f32.mrb[8].mxu1 }
 0x247   :  { %v580_v22 = vadd.f32 %v1090_v21, %v896_v56  ;;  %v481_v23 = vpop.f32.mrb[9].mxu1 }
 0x248   :  { %v578_v24 = vadd.f32 %v896_v56, %v481_v23  ;;  %v1091_v25 = vpop.f32.mrb[10].mxu1  ;;  %1116 = vmatprep.mubr.bf16.mxu0 %v604_v20 }
 0x249   :  { %v581_v26 = vadd.f32 %v1091_v25, %v896_v56  ;;  %v484_v27 = vpop.f32.mrb[11].mxu1  ;;  %1117 = vmatmul.mubr.bf16.gmra.mrb[20].mxu0 %v605_v19  ;;  %v596_v29 = vmax.f32 %v580_v22, 0.0 }
 0x24a   :  { %v579_v28 = vadd.f32 %v896_v56, %v484_v27  ;;  %v594_v31 = vmax.f32 %v578_v24, 0.0 }
 0x24b   :  { %v597_v30 = vmax.f32 %v581_v26, 0.0 }
 0x24c   :  { %v595_v32 = vmax.f32 %v579_v28, 0.0 }
 0x24d   :  { %v607_v33 = vpack.c.bf16 %v597_v30, %v596_v29 }
 0x24e   :  { %v606_v34 = vpack.c.bf16 %v595_v32, %v594_v31  ;;  %v1094_v35 = vpop.f32.mrb[12].mxu1 }
 0x24f   :  { %v584_v36 = vadd.f32 %v1094_v35, %v896_v56  ;;  %v497_v37 = vpop.f32.mrb[13].mxu1 }
 0x250   :  { %v582_v38 = vadd.f32 %v896_v56, %v497_v37  ;;  %v1095_v39 = vpop.f32.mrb[14].mxu1  ;;  %1120 = vmatprep.mubr.bf16.mxu1 %v606_v34 }
 0x251   :  { %v585_v40 = vadd.f32 %v1095_v39, %v896_v56  ;;  %v500_v41 = vpop.f32.mrb[15].mxu1  ;;  %1121 = vmatmul.mubr.bf16.vlgmr.msra.gmra.mrb[16].mxu1 %v607_v33  ;;  %v600_v43 = vmax.f32 %v584_v36, 0.0 }
 0x252   :  { %v583_v42 = vadd.f32 %v896_v56, %v500_v41  ;;  %v598_v45 = vmax.f32 %v582_v38, 0.0 }
 0x253   :  { %v601_v44 = vmax.f32 %v585_v40, 0.0 }
 0x254   :  { %v599_v46 = vmax.f32 %v583_v42, 0.0 }
 0x255   :  { %v609_v47 = vpack.c.bf16 %v601_v44, %v600_v43 }
 0x256   :  { %v608_v48 = vpack.c.bf16 %v599_v46, %v598_v45 }
 0x258   :  { %1124 = vmatprep.mubr.bf16.mxu1 %v608_v48 }
 0x259   :  { %1125 = vmatmul.mubr.bf16.gmra.mrb[20].mxu1 %v609_v47 }
 0x314   :  { %v1114_v49 = vpop.f32.mrb[16].mxu0 }
 0x315   :  { %v708_v50 = vpop.f32.mrb[17].mxu0 }
 0x316   :  { %v1115_v51 = vpop.f32.mrb[18].mxu0 }
 0x317   :  { %v945_v52 = vpack.c.bf16 %v1115_v51, %v1114_v49  ;;  %v711_v53 = vpop.f32.mrb[19].mxu0 }
 0x318   :  { %v940_v54 = vpack.c.bf16 %v711_v53, %v708_v50 }
 0x319   :  { %977 = vst [vmem:[#allocation11 + $0x8] sm:$0xff] %v945_v52  }
 0x31a   :  { %941 = vst [vmem:[#allocation11] sm:$0xff] %v940_v54  }
 0x31c   :  { %v1118_v55 = vpop.f32.mrb[20].mxu0 }
 0x31d   :  { %v724_v57 = vpop.f32.mrb[21].mxu0 }
 0x31e   :  { %v1119_v58 = vpop.f32.mrb[22].mxu0 }
 0x31f   :  { %v955_v56 = vpack.c.bf16 %v1119_v58, %v1118_v55  ;;  %v727_v59 = vpop.f32.mrb[23].mxu0 }
 0x320   :  { %v950_v60 = vpack.c.bf16 %v727_v59, %v724_v57 }
 0x321   :  { %979 = vst [vmem:[#allocation11 + $0x18] sm:$0xff] %v955_v56  }
 0x322   :  { %978 = vst [vmem:[#allocation11 + $0x10] sm:$0xff] %v950_v60  }
 0x324   :  { %v1122_v61 = vpop.f32.mrb[16].mxu1 }
 0x325   :  { %v740_v62 = vpop.f32.mrb[17].mxu1 }
 0x326   :  { %v1123_v63 = vpop.f32.mrb[18].mxu1 }
 0x327   :  { %v965_v0 = vpack.c.bf16 %v1123_v63, %v1122_v61  ;;  %v743_v1 = vpop.f32.mrb[19].mxu1 }
 0x328   :  { %v960_v2 = vpack.c.bf16 %v743_v1, %v740_v62 }
 0x329   :  { %981 = vst [vmem:[#allocation11 + $0x28] sm:$0xff] %v965_v0  }
 0x32a   :  { %980 = vst [vmem:[#allocation11 + $0x20] sm:$0xff] %v960_v2  }
 0x32c   :  { %v1126_v3 = vpop.f32.mrb[20].mxu1 }
 0x32d   :  { %v756_v4 = vpop.f32.mrb[21].mxu1 }
 0x32e   :  { %v1127_v5 = vpop.f32.mrb[22].mxu1 }
 0x32f   :  { %v975_v6 = vpack.c.bf16 %v1127_v5, %v1126_v3  ;;  %v759_v7 = vpop.f32.mrb[23].mxu1 }
 0x330   :  { %v970_v8 = vpack.c.bf16 %v759_v7, %v756_v4 }
 0x331   :  { %983 = vst [vmem:[#allocation11 + $0x38] sm:$0xff] %v975_v6  }
 0x332   :  { %982 = vst [vmem:[#allocation11 + $0x30] sm:$0xff] %v970_v8  }
 0x333   :  { %1282 = shalt.err (!%p1279_p8)
}
 0x334   :  { %s1283_s22 = scalar_lea.hbm %s1465_s5, 1024 }
 0x335   :  { %p1284_p9 = scmp.ne.s32.totalorder %s1465_s5, %s1283_s22  ;;  %p1287_p10 = scmp.lt.u32.totalorder %s1283_s22, %s1465_s5 }
 0x337   :  { %p1289_p11 = pnand %p1287_p10, %p1284_p9 }
 0x339   :  { %1292 = shalt.err (!%p1289_p11)
}
 0x33a   :  { %862 = dma.vmem_to_hbm [thread:$0]  %s857_s17, 1024, %s1465_s5, [#allocation5], %s1303_s30, %s1303_s30, %s1304_s6  }
 0x33b   :  { %1299 = dma.done.wait [#allocation5], 1024  }
 0x33c   :  { %1300 = vsyncadd [#allocation5], 4294966272 }
 0x33d   :  { %866 = vsyncpa [#allocation4], 1 }
 0x33e   :  { %867 = vsyncpa [#allocation7], 1 }
 0x33f   :  { %868 = vsyncpa [#allocation10], 1 }
 0x340   :  { %869 = vsyncpa [#allocation5], 1 }

</bundles_post_ra>
